<compile_context>
chip_gen: v5e
topology: v5e:2x2
jax: 0.10.0
libtpu: 0.0.40
codegen_flags: <defaults>
</compile_context>

<pallas_src>
import math

import jax
import jax.numpy as jnp
from jax import lax
from jax.experimental import pallas as pl
from jax.experimental.pallas import tpu as pltpu


def _round_up(n, m):
    return ((n + m - 1) // m) * m


def invnet_kernel(x_ref, w1_ref, b1_ref, w2_ref, b2_ref,
                  w3_ref, b3_ref, w4_ref, b4_ref, out_ref):
    # x_ref: (TB, 4) bf16 (row-major); weights: bf16 (out, in); biases: f32 (out, 1).
    x = x_ref[...]
    # Layer 1: contract x's feature axis directly -> feature-major (64, TB).
    h = lax.dot_general(w1_ref[...], x,
                        dimension_numbers=(((1,), (1,)), ((), ())),
                        preferred_element_type=jnp.float32) + b1_ref[...]
    h = jnp.maximum(h, 0.0).astype(jnp.bfloat16)
    h = jnp.dot(w2_ref[...], h, preferred_element_type=jnp.float32) + b2_ref[...]
    h = jnp.maximum(h, 0.0).astype(jnp.bfloat16)
    h = jnp.dot(w3_ref[...], h, preferred_element_type=jnp.float32) + b3_ref[...]
    h = jnp.maximum(h, 0.0).astype(jnp.bfloat16)
    y = jnp.dot(w4_ref[...], h, preferred_element_type=jnp.float32) + b4_ref[...]
    # Row 0 = mu, row 1 = log_sigma -> sigma = exp(log_sigma). Single merged,
    # lane-dense (2, TB) store.
    row = lax.broadcasted_iota(jnp.int32, y.shape, 0)
    out_ref[...] = jnp.where(row == 1, jnp.exp(y), y)


def invnet_forward(x, params, *, block_b_max=4096, min_tiles=2):
    """x: (B, 4) float32. Returns (mu, sigma), each (B, 1) float32."""
    B = x.shape[0]
    # Lane-dense batch tile: multiple of 128, capped at block_b_max, split into
    # >= min_tiles tiles (when B > 128) so v7x's two TensorCores both get work.
    B_al = _round_up(B, 128)
    n_tiles = max(min_tiles, pl.cdiv(B_al, block_b_max))
    TB = min(_round_up(pl.cdiv(B, n_tiles), 128), B_al)
    B_pad = _round_up(B, TB)
    grid = (B_pad // TB,)

    # Row-major bf16 input (no wrapper transpose); pad only if needed.
    x_in = x.astype(jnp.bfloat16)
    if B_pad != B:
        x_in = jnp.pad(x_in, ((0, B_pad - B), (0, 0)))

    in_specs = [pl.BlockSpec((TB, 4), lambda i: (i, 0))]
    # Parameters: constant block index -> fetched once, VMEM-resident across tiles.
    in_specs += [pl.BlockSpec(p.shape, lambda i: (0, 0)) for p in params]

    out_specs = pl.BlockSpec((2, TB), lambda i: (0, i))
    out_shape = jax.ShapeDtypeStruct((2, B_pad), jnp.float32)

    y = pl.pallas_call(
        invnet_kernel,
        out_shape=out_shape,
        grid=grid,
        in_specs=in_specs,
        out_specs=out_specs,
        compiler_params=pltpu.CompilerParams(
            dimension_semantics=("parallel",),
        ),
    )(x_in, *params)

    mu = y[0, :B].reshape(B, 1)
    sigma = y[1, :B].reshape(B, 1)
    return mu, sigma


def init_params(key):
    """Deterministic init mimicking nn.Linear's U(-1/sqrt(fan_in), 1/sqrt(fan_in)).

    Weights kept in PyTorch's (out, in) layout, stored as bf16 for the MXU.
    Biases stored as (out, 1) f32 columns for lane-wise broadcast.
    """
    dims = [(4, 64), (64, 128), (128, 64), (64, 2)]
    params = []
    for (fan_in, fan_out) in dims:
        key, kw, kb = jax.random.split(key, 3)
        bound = 1.0 / math.sqrt(fan_in)
        w = jax.random.uniform(kw, (fan_out, fan_in), jnp.float32, -bound, bound)
        b = jax.random.uniform(kb, (fan_out, 1), jnp.float32, -bound, bound)
        params.extend([w.astype(jnp.bfloat16), b])
    return tuple(params)


def reference_forward(x, params):
    """Pure-JAX reference with the same bf16-operand / f32-accumulate numerics."""
    w1, b1, w2, b2, w3, b3, w4, b4 = params

    def linear(h, w, b):
        return jnp.dot(h.astype(jnp.bfloat16), w.T,
                       preferred_element_type=jnp.float32) + b.T

    h = jnp.maximum(linear(x, w1, b1), 0.0)
    h = jnp.maximum(linear(h, w2, b2), 0.0)
    h = jnp.maximum(linear(h, w3, b3), 0.0)
    y = linear(h, w4, b4)
    return y[:, 0:1], jnp.exp(y[:, 1:2])


if __name__ == "__main__":
    key = jax.random.PRNGKey(0)
    key, kx = jax.random.split(key)
    params = init_params(key)

    # B=8: single 128-wide tile (padded). B=300: two 256-wide tiles with tail
    # padding. B=512: two 256-wide tiles, exact fit (no pad op).
    for B in (8, 300, 512):
        x = jax.random.normal(jax.random.fold_in(kx, B), (B, 4), dtype=jnp.float32)
        mu, sigma = invnet_forward(x, params)
        jax.block_until_ready((mu, sigma))

        mu_ref, sigma_ref = reference_forward(x, params)
        assert mu.shape == (B, 1) and sigma.shape == (B, 1)
        assert jnp.allclose(mu, mu_ref, atol=2e-3, rtol=2e-3), \
            float(jnp.max(jnp.abs(mu - mu_ref)))
        assert jnp.allclose(sigma, sigma_ref, atol=2e-3, rtol=2e-3), \
            float(jnp.max(jnp.abs(sigma - sigma_ref)))

    print("KERNEL_OK")
</pallas_src>

<mosaic_0001>
module attributes {stable_mosaic.version = 11 : i64} {
  func.func @invnet_kernel(%arg0: i32, %arg1: memref<128x4xbf16, #tpu.memory_space<vmem>>, %arg2: memref<64x4xbf16, #tpu.memory_space<vmem>>, %arg3: memref<64x1xf32, #tpu.memory_space<vmem>>, %arg4: memref<128x64xbf16, #tpu.memory_space<vmem>>, %arg5: memref<128x1xf32, #tpu.memory_space<vmem>>, %arg6: memref<64x128xbf16, #tpu.memory_space<vmem>>, %arg7: memref<64x1xf32, #tpu.memory_space<vmem>>, %arg8: memref<2x64xbf16, #tpu.memory_space<vmem>>, %arg9: memref<2x1xf32, #tpu.memory_space<vmem>>, %arg10: memref<2x128xf32, #tpu.memory_space<vmem>>) attributes {dimension_semantics = [#tpu.dimension_semantics<parallel>], iteration_bounds = array<i64: 1>, scalar_prefetch = 0 : i64, scratch_operands = 0 : i64, tpu.core_type = #tpu.core_type<tc>, window_params = [{transform_indices = @transform_0, window_bounds = array<i64: 128, 4>}, {pipeline_mode = #tpu.pipeline_mode<synchronous>, transform_indices = @transform_1, window_bounds = array<i64: 64, 4>}, {pipeline_mode = #tpu.pipeline_mode<synchronous>, transform_indices = @transform_2, window_bounds = array<i64: 64, 1>}, {pipeline_mode = #tpu.pipeline_mode<synchronous>, transform_indices = @transform_3, window_bounds = array<i64: 128, 64>}, {pipeline_mode = #tpu.pipeline_mode<synchronous>, transform_indices = @transform_4, window_bounds = array<i64: 128, 1>}, {pipeline_mode = #tpu.pipeline_mode<synchronous>, transform_indices = @transform_5, window_bounds = array<i64: 64, 128>}, {pipeline_mode = #tpu.pipeline_mode<synchronous>, transform_indices = @transform_6, window_bounds = array<i64: 64, 1>}, {pipeline_mode = #tpu.pipeline_mode<synchronous>, transform_indices = @transform_7, window_bounds = array<i64: 2, 64>}, {pipeline_mode = #tpu.pipeline_mode<synchronous>, transform_indices = @transform_8, window_bounds = array<i64: 2, 1>}, {transform_indices = @transform_9, window_bounds = array<i64: 2, 128>}]} {
    %c0 = arith.constant 0 : index
    %c0_0 = arith.constant 0 : index
    %0 = vector.load %arg1[%c0, %c0_0] : memref<128x4xbf16, #tpu.memory_space<vmem>>, vector<128x4xbf16>
    %c0_1 = arith.constant 0 : index
    %c0_2 = arith.constant 0 : index
    %1 = vector.load %arg2[%c0_1, %c0_2] : memref<64x4xbf16, #tpu.memory_space<vmem>>, vector<64x4xbf16>
    %cst = arith.constant dense<0.000000e+00> : vector<64x128xf32>
    %2 = tpu.matmul %1, %0, %cst {dimension_numbers = #tpu.dot_dimension_numbers<[1], [1], [0], [0], [0, 0, 1, 0], [], []>} : vector<64x4xbf16>, vector<128x4xbf16>, vector<64x128xf32> -> vector<64x128xf32>
    %c0_3 = arith.constant 0 : index
    %c0_4 = arith.constant 0 : index
    %3 = vector.load %arg3[%c0_3, %c0_4] : memref<64x1xf32, #tpu.memory_space<vmem>>, vector<64x1xf32>
    %4 = vector.broadcast %3 : vector<64x1xf32> to vector<64x128xf32>
    %5 = arith.addf %2, %4 : vector<64x128xf32>
    %cst_5 = arith.constant 0.000000e+00 : f32
    %6 = vector.broadcast %cst_5 : f32 to vector<64x128xf32>
    %7 = arith.maximumf %5, %6 : vector<64x128xf32>
    %8 = arith.truncf %7 : vector<64x128xf32> to vector<64x128xbf16>
    %c0_6 = arith.constant 0 : index
    %c0_7 = arith.constant 0 : index
    %9 = vector.load %arg4[%c0_6, %c0_7] : memref<128x64xbf16, #tpu.memory_space<vmem>>, vector<128x64xbf16>
    %cst_8 = arith.constant dense<0.000000e+00> : vector<128x128xf32>
    %10 = tpu.matmul %9, %8, %cst_8 {dimension_numbers = #tpu.dot_dimension_numbers<[1], [0], [0], [1], [0, 0, 1, 1], [], []>} : vector<128x64xbf16>, vector<64x128xbf16>, vector<128x128xf32> -> vector<128x128xf32>
    %c0_9 = arith.constant 0 : index
    %c0_10 = arith.constant 0 : index
    %11 = vector.load %arg5[%c0_9, %c0_10] : memref<128x1xf32, #tpu.memory_space<vmem>>, vector<128x1xf32>
    %12 = vector.broadcast %11 : vector<128x1xf32> to vector<128x128xf32>
    %13 = arith.addf %10, %12 : vector<128x128xf32>
    %cst_11 = arith.constant 0.000000e+00 : f32
    %14 = vector.broadcast %cst_11 : f32 to vector<128x128xf32>
    %15 = arith.maximumf %13, %14 : vector<128x128xf32>
    %16 = arith.truncf %15 : vector<128x128xf32> to vector<128x128xbf16>
    %c0_12 = arith.constant 0 : index
    %c0_13 = arith.constant 0 : index
    %17 = vector.load %arg6[%c0_12, %c0_13] : memref<64x128xbf16, #tpu.memory_space<vmem>>, vector<64x128xbf16>
    %cst_14 = arith.constant dense<0.000000e+00> : vector<64x128xf32>
    %18 = tpu.matmul %17, %16, %cst_14 {dimension_numbers = #tpu.dot_dimension_numbers<[1], [0], [0], [1], [0, 0, 1, 1], [], []>} : vector<64x128xbf16>, vector<128x128xbf16>, vector<64x128xf32> -> vector<64x128xf32>
    %c0_15 = arith.constant 0 : index
    %c0_16 = arith.constant 0 : index
    %19 = vector.load %arg7[%c0_15, %c0_16] : memref<64x1xf32, #tpu.memory_space<vmem>>, vector<64x1xf32>
    %20 = vector.broadcast %19 : vector<64x1xf32> to vector<64x128xf32>
    %21 = arith.addf %18, %20 : vector<64x128xf32>
    %cst_17 = arith.constant 0.000000e+00 : f32
    %22 = vector.broadcast %cst_17 : f32 to vector<64x128xf32>
    %23 = arith.maximumf %21, %22 : vector<64x128xf32>
    %24 = arith.truncf %23 : vector<64x128xf32> to vector<64x128xbf16>
    %c0_18 = arith.constant 0 : index
    %c0_19 = arith.constant 0 : index
    %25 = vector.load %arg8[%c0_18, %c0_19] : memref<2x64xbf16, #tpu.memory_space<vmem>>, vector<2x64xbf16>
    %cst_20 = arith.constant dense<0.000000e+00> : vector<2x128xf32>
    %26 = tpu.matmul %25, %24, %cst_20 {dimension_numbers = #tpu.dot_dimension_numbers<[1], [0], [0], [1], [0, 0, 1, 1], [], []>} : vector<2x64xbf16>, vector<64x128xbf16>, vector<2x128xf32> -> vector<2x128xf32>
    %c0_21 = arith.constant 0 : index
    %c0_22 = arith.constant 0 : index
    %27 = vector.load %arg9[%c0_21, %c0_22] : memref<2x1xf32, #tpu.memory_space<vmem>>, vector<2x1xf32>
    %28 = vector.broadcast %27 : vector<2x1xf32> to vector<2x128xf32>
    %29 = arith.addf %26, %28 : vector<2x128xf32>
    %30 = tpu.iota {dimensions = array<i32: 0>} : vector<2x128xi32>
    %c1_i32 = arith.constant 1 : i32
    %31 = vector.broadcast %c1_i32 : i32 to vector<2x128xi32>
    %32 = arith.cmpi eq, %30, %31 : vector<2x128xi32>
    %33 = math.exp %29 : vector<2x128xf32>
    %34 = arith.select %32, %33, %29 : vector<2x128xi1>, vector<2x128xf32>
    %c0_23 = arith.constant 0 : index
    %c0_24 = arith.constant 0 : index
    %35 = vector.load %arg10[%c0_23, %c0_24] : memref<2x128xf32, #tpu.memory_space<vmem>>, vector<2x128xf32>
    tpu.vector_store %arg10[%c0_23, %c0_24], %34 {strides = array<i32>} : memref<2x128xf32, #tpu.memory_space<vmem>>, vector<2x128xf32>,
    return
  }
  func.func @transform_0(%arg0: i32) -> (i32, i32) {
    %c0_i32 = arith.constant 0 : i32
    %c0_i32_0 = arith.constant 0 : i32
    return %arg0, %c0_i32 : i32, i32
  }
  func.func @transform_1(%arg0: i32) -> (i32, i32) {
    %c0_i32 = arith.constant 0 : i32
    %c0_i32_0 = arith.constant 0 : i32
    %c0_i32_1 = arith.constant 0 : i32
    return %c0_i32, %c0_i32_0 : i32, i32
  }
  func.func @transform_2(%arg0: i32) -> (i32, i32) {
    %c0_i32 = arith.constant 0 : i32
    %c0_i32_0 = arith.constant 0 : i32
    %c0_i32_1 = arith.constant 0 : i32
    return %c0_i32, %c0_i32_0 : i32, i32
  }
  func.func @transform_3(%arg0: i32) -> (i32, i32) {
    %c0_i32 = arith.constant 0 : i32
    %c0_i32_0 = arith.constant 0 : i32
    %c0_i32_1 = arith.constant 0 : i32
    return %c0_i32, %c0_i32_0 : i32, i32
  }
  func.func @transform_4(%arg0: i32) -> (i32, i32) {
    %c0_i32 = arith.constant 0 : i32
    %c0_i32_0 = arith.constant 0 : i32
    %c0_i32_1 = arith.constant 0 : i32
    return %c0_i32, %c0_i32_0 : i32, i32
  }
  func.func @transform_5(%arg0: i32) -> (i32, i32) {
    %c0_i32 = arith.constant 0 : i32
    %c0_i32_0 = arith.constant 0 : i32
    %c0_i32_1 = arith.constant 0 : i32
    return %c0_i32, %c0_i32_0 : i32, i32
  }
  func.func @transform_6(%arg0: i32) -> (i32, i32) {
    %c0_i32 = arith.constant 0 : i32
    %c0_i32_0 = arith.constant 0 : i32
    %c0_i32_1 = arith.constant 0 : i32
    return %c0_i32, %c0_i32_0 : i32, i32
  }
  func.func @transform_7(%arg0: i32) -> (i32, i32) {
    %c0_i32 = arith.constant 0 : i32
    %c0_i32_0 = arith.constant 0 : i32
    %c0_i32_1 = arith.constant 0 : i32
    return %c0_i32, %c0_i32_0 : i32, i32
  }
  func.func @transform_8(%arg0: i32) -> (i32, i32) {
    %c0_i32 = arith.constant 0 : i32
    %c0_i32_0 = arith.constant 0 : i32
    %c0_i32_1 = arith.constant 0 : i32
    return %c0_i32, %c0_i32_0 : i32, i32
  }
  func.func @transform_9(%arg0: i32) -> (i32, i32) {
    %c0_i32 = arith.constant 0 : i32
    %c0_i32_0 = arith.constant 0 : i32
    return %c0_i32, %arg0 : i32, i32
  }
}

</mosaic_0001>

<bundles_post_ra>
// kernel: tpu_custom_call.1
= control target key start
LH: loop header
LB: loop body
LE: loop exit
PB: predicated region body
PF: predicated region fallthrough
CT: control target
= control target key end

     0   :  { %vm166_vm0 = vcmask 31744   ;;  %s1081_s0 = inlined_call_operand.vmem [shape: bf16[128,4], index: 0, kind: input, shape index: {}]   ;;  %s1082_s1 = inlined_call_operand.vmem [shape: bf16[64,4], index: 1, kind: input, shape index: {}]   ;;  %s1083_s2 = inlined_call_operand.vmem [shape: f32[64,1], index: 2, kind: input, shape index: {}]   ;;  %s1084_s3 = inlined_call_operand.vmem [shape: bf16[128,64], index: 3, kind: input, shape index: {}]   ;;  %s1085_s4 = inlined_call_operand.vmem [shape: f32[128,1], index: 4, kind: input, shape index: {}]   ;;  %s1086_s5 = inlined_call_operand.vmem [shape: bf16[64,128], index: 5, kind: input, shape index: {}]   ;;  %s1087_s6 = inlined_call_operand.vmem [shape: f32[64,1], index: 6, kind: input, shape index: {}]   ;;  %s1088_s7 = inlined_call_operand.vmem [shape: bf16[2,64], index: 7, kind: input, shape index: {}]   ;;  %s1089_s8 = inlined_call_operand.vmem [shape: f32[2,1], index: 8, kind: input, shape index: {}]   ;;  %s1090_s9 = inlined_call_operand.hbm [shape: f32[2,128], index: 9, kind: output, shape index: {}]  }
   0x1   :  { %v777_v0 = vld [vmem:[%s1081_s0 + $0x38] sm:$0xff] }
   0x2   :  { %14 = vsyncpa [#allocation3], 0  ;;  %v201_v1 = vsel %vm166_vm0, %v777_v0, 0  ;;  %v776_v2 = vld [vmem:[%s1081_s0 + $0x30] sm:$0xff]  ;;  %v62_v5 = vld [vmem:[%s1083_s2 + $0x20] sm:$0xff]  ;;  %v831_v7 = vmov 0  }
   0x3   :  { %203 = vmatpush.bf16.xpose.msra.mxu0 %v201_v1  ;;  %v198_v3 = vsel %vm166_vm0, %v776_v2, 0  ;;  %v64_v4 = vld [vmem:[%s1083_s2 + $0x30] sm:$0xff]  ;;  %v775_v6 = vld [vmem:[%s1081_s0 + $0x28] sm:$0xff]  ;;  %800 = vset.pattern.permute.xlu0 %v831_v7  ;;  %v65_v9 = vld [vmem:[%s1083_s2 + $0x38] sm:$0xff]  ;;  %vm396_vm1 = vcmask 523264   ;;  %s832_s29 = smov [#allocation2]  }
   0x4   :  { %801 = vset.pattern.permute.xlu1 %v831_v7  ;;  %98 = vperm.xlu0 %800, %v64_v4   ;;  %v195_v8 = vsel %vm166_vm0, %v775_v6, 0  ;;  %v63_v10 = vld [vmem:[%s1083_s2 + $0x28] sm:$0xff]  ;;  %v774_v11 = vld [vmem:[%s1081_s0 + $0x20] sm:$0xff]  ;;  %v773_v15 = vld [vmem:[%s1081_s0 + $0x18] sm:$0xff] }
   0x5   :  { %88 = vperm.xlu1 %801, %v62_v5   ;;  %802 = vset.pattern.permute.xlu2 %v831_v7  ;;  %v192_v12 = vsel %vm166_vm0, %v774_v11, 0  ;;  %v58_v13 = vld [vmem:[%s1083_s2] sm:$0xff]  ;;  %v59_v14 = vld [vmem:[%s1083_s2 + $0x8] sm:$0xff]  ;;  %v189_v16 = vsel %vm166_vm0, %v773_v15, 0  ;;  %v275_v17 = vld [vmem:[%s1085_s4 + $0x78] sm:$0xff] }
   0x6   :  { %v272_v18 = vld [vmem:[%s1085_s4 + $0x60] sm:$0xff]  ;;  %v60_v19 = vld [vmem:[%s1083_s2 + $0x10] sm:$0xff]  ;;  %v271_v23 = vld [vmem:[%s1085_s4 + $0x58] sm:$0xff] }
   0x7   :  { %78 = vperm.xlu2 %802, %v60_v19   ;;  %v772_v20 = vld [vmem:[%s1081_s0 + $0x10] sm:$0xff]  ;;  %v771_v24 = vld [vmem:[%s1081_s0 + $0x8] sm:$0xff]  ;;  %v61_v26 = vld [vmem:[%s1083_s2 + $0x18] sm:$0xff] }
   0x8   :  { %v186_v21 = vsel %vm166_vm0, %v772_v20, 0  ;;  %v270_v22 = vld [vmem:[%s1085_s4 + $0x50] sm:$0xff]  ;;  %v183_v25 = vsel %vm166_vm0, %v771_v24, 0  ;;  %v269_v27 = vld [vmem:[%s1085_s4 + $0x48] sm:$0xff]  ;;  %v770_v29 = vld [vmem:[%s1081_s0] sm:$0xff] }
   0x9   :  { %v266_v28 = vld [vmem:[%s1085_s4 + $0x30] sm:$0xff]  ;;  %v180_v30 = vsel %vm166_vm0, %v770_v29, 0  ;;  %v264_v32 = vld [vmem:[%s1085_s4 + $0x20] sm:$0xff]  ;;  %v265_v33 = vld [vmem:[%s1085_s4 + $0x28] sm:$0xff] }
   0xa   :  { %v274_v31 = vld [vmem:[%s1085_s4 + $0x70] sm:$0xff]  ;;  %v778_v34 = vld [vmem:[%s1082_s1] sm:$0xff]  ;;  %v273_v35 = vld [vmem:[%s1085_s4 + $0x68] sm:$0xff] }
   0xb   :  { %204 = vmatpush.bf16.xpose.msra.mxu0 %v198_v3  ;;  %v263_v36 = vld [vmem:[%s1085_s4 + $0x18] sm:$0xff]  ;;  %v260_v37 = vld [vmem:[%s1085_s4] sm:$0xff]  ;;  %v508_v39 = vld [vmem:[%s1087_s6 + $0x30] sm:$0xff] }
   0xc   :  { %103 = vperm.xlu0 %800, %v65_v9   ;;  %v268_v38 = vld [vmem:[%s1085_s4 + $0x40] sm:$0xff]  ;;  %v509_v40 = vld [vmem:[%s1087_s6 + $0x38] sm:$0xff]  ;;  %v779_v41 = vld [vmem:[%s1082_s1 + $0x8] sm:$0xff] }
   0xd   :  { %93 = vperm.xlu1 %801, %v63_v10   ;;  %v267_v42 = vld [vmem:[%s1085_s4 + $0x38] sm:$0xff]  ;;  %v507_v43 = vld [vmem:[%s1087_s6 + $0x28] sm:$0xff]  ;;  %v504_v44 = vld [vmem:[%s1087_s6 + $0x10] sm:$0xff] }
   0xe   :  { %v262_v45 = vld [vmem:[%s1085_s4 + $0x10] sm:$0xff]  ;;  %v502_v46 = vld [vmem:[%s1087_s6] sm:$0xff]  ;;  %v503_v47 = vld [vmem:[%s1087_s6 + $0x8] sm:$0xff] }
   0xf   :  { %83 = vperm.xlu2 %802, %v61_v26   ;;  %v780_v48 = vld [vmem:[%s1082_s1 + $0x10] sm:$0xff]  ;;  %v261_v49 = vld [vmem:[%s1085_s4 + $0x8] sm:$0xff]  ;;  %v506_v50 = vld [vmem:[%s1087_s6 + $0x20] sm:$0xff]  ;;  %s650_s4 = sshll.u32 %s832_s29, 4  ;;  %s651_s4 = int_to_ptr.vmem [resolvable:$true] %s650_s4 }
  0x10   :  { %v781_v51 = vld [vmem:[%s1082_s1 + $0x18] sm:$0xff]  ;;  %v616_v53 = vld [vmem:[%s1089_s8] sm:$0x3] }
  0x11   :  { %v505_v52 = vld [vmem:[%s1087_s6 + $0x18] sm:$0xff]  ;;  %v782_v26 = vld [vmem:[%s1084_s3] sm:$0xff]  ;;  %s652_s6 = sshll.u32 %s1090_s9, 4  ;;  %s653_s6 = int_to_ptr.hbm [resolvable:$true] %s652_s6 }
  0x12   :  { %v789_v29 = vld [vmem:[%s1084_s3 + $0x38] sm:$0xff] }
  0x13   :  { %205 = vmatpush.bf16.xpose.msra.mxu0 %v195_v8 }
  0x14   :  { %68 = vperm.xlu0 %800, %v58_v13  }
  0x15   :  { %73 = vperm.xlu1 %801, %v59_v14  }
  0x17   :  { %348 = vperm.xlu2 %802, %v274_v31   ;;  %v785_v31 = vld [vmem:[%s1084_s3 + $0x18] sm:$0xff] }
  0x1b   :  { %206 = vmatpush.bf16.xpose.msra.mxu0 %v192_v12 }
  0x1c   :  { %353 = vperm.xlu0 %800, %v275_v17  }
  0x1d   :  { %338 = vperm.xlu1 %801, %v272_v18  }
  0x1f   :  { %343 = vperm.xlu2 %802, %v273_v35  }
  0x23   :  { %207 = vmatpush.bf16.xpose.msra.mxu0 %v189_v16 }
  0x24   :  { %328 = vperm.xlu0 %800, %v270_v22  }
  0x25   :  { %333 = vperm.xlu1 %801, %v271_v23  }
  0x27   :  { %318 = vperm.xlu2 %802, %v268_v38  }
  0x2b   :  { %208 = vmatpush.bf16.xpose.msra.mxu0 %v186_v21 }
  0x2c   :  { %323 = vperm.xlu0 %800, %v269_v27   ;;  %v788_v27 = vld [vmem:[%s1084_s3 + $0x30] sm:$0xff] }
  0x2d   :  { %308 = vperm.xlu1 %801, %v266_v28   ;;  %v783_v28 = vld [vmem:[%s1084_s3 + $0x8] sm:$0xff] }
  0x2f   :  { %313 = vperm.xlu2 %802, %v267_v42  }
  0x33   :  { %209 = vmatpush.bf16.xpose.msra.mxu0 %v183_v25 }
  0x34   :  { %298 = vperm.xlu0 %800, %v264_v32   ;;  %v786_v32 = vld [vmem:[%s1084_s3 + $0x20] sm:$0xff] }
  0x35   :  { %303 = vperm.xlu1 %801, %v265_v33   ;;  %v787_v33 = vld [vmem:[%s1084_s3 + $0x28] sm:$0xff] }
  0x37   :  { %288 = vperm.xlu2 %802, %v262_v45  }
  0x3b   :  { %210 = vmatpush.bf16.xpose.msra.mxu0 %v180_v30  ;;  %v784_v30 = vld [vmem:[%s1084_s3 + $0x10] sm:$0xff] }
  0x3c   :  { %293 = vperm.xlu0 %800, %v263_v36  }
  0x3d   :  { %278 = vperm.xlu1 %801, %v260_v37  }
  0x3f   :  { %283 = vperm.xlu2 %802, %v261_v49  }
  0x42   :  { %709 = vmatmul.msk.bf16.vlgmr.msra.gmra.mxu0 %vm166_vm0, %v778_v34 }
  0x44   :  { %542 = vperm.xlu0 %800, %v508_v39  }
  0x45   :  { %547 = vperm.xlu1 %801, %v509_v40  }
  0x47   :  { %532 = vperm.xlu2 %802, %v506_v50  }
  0x4c   :  { %537 = vperm.xlu0 %800, %v507_v43  }
  0x4d   :  { %522 = vperm.xlu1 %801, %v504_v44  }
  0x4f   :  { %527 = vperm.xlu2 %802, %v505_v52  }
  0x52   :  { %710 = vmatmul.msk.bf16.gmra.mxu0 %vm166_vm0, %v779_v41 }
  0x54   :  { %512 = vperm.xlu0 %800, %v502_v46  }
  0x55   :  { %517 = vperm.xlu1 %801, %v503_v47  }
  0x57   :  { %619 = vperm.xlu2 %802, %v616_v53  }
  0x61   :  { %v79_v63 = vpop.permute.xlu2 %78 }
  0x62   :  { %711 = vmatmul.msk.bf16.gmra.mxu0 %vm166_vm0, %v780_v48 }
  0x69   :  { %v84_v9 = vpop.permute.xlu2 %83 }
  0x71   :  { %v349_v34 = vpop.permute.xlu2 %348 }
  0x72   :  { %712 = vmatmul.msk.bf16.gmra.mxu0 %vm166_vm0, %v781_v51 }
  0x76   :  { %v99_v61 = vpop.permute.xlu0 %98 }
  0x77   :  { %v89_v60 = vpop.permute.xlu1 %88 }
  0x79   :  { %v344_v36 = vpop.permute.xlu2 %343 }
  0x7e   :  { %v104_v2 = vpop.permute.xlu0 %103 }
  0x7f   :  { %v94_v0 = vpop.permute.xlu1 %93 }
  0x81   :  { %v319_v38 = vpop.permute.xlu2 %318 }
  0x86   :  { %v69_v19 = vpop.permute.xlu0 %68 }
  0x87   :  { %v74_v15 = vpop.permute.xlu1 %73 }
  0x89   :  { %v314_v41 = vpop.permute.xlu2 %313 }
  0x8e   :  { %v354_v39 = vpop.permute.xlu0 %353 }
  0x8f   :  { %v339_v35 = vpop.permute.xlu1 %338 }
  0x91   :  { %v289_v44 = vpop.permute.xlu2 %288 }
  0x96   :  { %v329_v42 = vpop.permute.xlu0 %328 }
  0x97   :  { %v334_v37 = vpop.permute.xlu1 %333 }
  0x99   :  { %v284_v50 = vpop.permute.xlu2 %283 }
  0x9e   :  { %v324_v46 = vpop.permute.xlu0 %323 }
  0x9f   :  { %v309_v40 = vpop.permute.xlu1 %308 }
  0xa7   :  { %v304_v43 = vpop.permute.xlu1 %303 }
  0xaf   :  { %v279_v47 = vpop.permute.xlu1 %278 }
  0xbf   :  { %v212_v54 = vpop.f32.mrf.mxu0 }
  0xc0   :  { %v213_v20 = vadd.f32 %v212_v54, %v69_v19 }
  0xc2   :  { %v232_v24 = vmax.f32 %v213_v20, 0.0 }
  0xc7   :  { %v214_v55 = vpop.f32.mrf.mxu0 }
  0xc8   :  { %v215_v16 = vadd.f32 %v214_v55, %v74_v15 }
  0xca   :  { %v233_v22 = vmax.f32 %v215_v16, 0.0 }
  0xcc   :  { %v240_v25 = vpack.c.bf16 %v233_v22, %v232_v24 }
  0xcf   :  { %v217_v56 = vpop.f32.mrf.mxu0 }
  0xd0   :  { %v218_v13 = vadd.f32 %v217_v56, %v79_v63  ;;  %v299_v56 = vpop.permute.xlu0 %298 }
  0xd2   :  { %v234_v21 = vmax.f32 %v218_v13, 0.0 }
  0xd7   :  { %v219_v57 = vpop.f32.mrf.mxu0 }
  0xd8   :  { %v220_v10 = vadd.f32 %v219_v57, %v84_v9 }
  0xda   :  { %v235_v17 = vmax.f32 %v220_v10, 0.0 }
  0xdc   :  { %v241_v23 = vpack.c.bf16 %v235_v17, %v234_v21 }
  0xdf   :  { %v222_v58 = vpop.f32.mrf.mxu0 }
  0xe0   :  { %v223_v6 = vadd.f32 %v222_v58, %v89_v60 }
  0xe2   :  { %v236_v14 = vmax.f32 %v223_v6, 0.0 }
  0xe7   :  { %v224_v59 = vpop.f32.mrf.mxu0 }
  0xe8   :  { %v225_v4 = vadd.f32 %v224_v59, %v94_v0 }
  0xea   :  { %v237_v11 = vmax.f32 %v225_v4, 0.0 }
  0xec   :  { %v242_v18 = vpack.c.bf16 %v237_v11, %v236_v14 }
  0xef   :  { %v227_v62 = vpop.f32.mrf.mxu0 }
  0xf0   :  { %v228_v1 = vadd.f32 %v227_v62, %v99_v61  ;;  %v294_v61 = vpop.permute.xlu0 %293 }
  0xf2   :  { %v238_v7 = vmax.f32 %v228_v1, 0.0 }
  0xf7   :  { %v229_v3 = vpop.f32.mrf.mxu0 }
  0xf8   :  { %v230_v5 = vadd.f32 %v229_v3, %v104_v2 }
  0xfa   :  { %v239_v8 = vmax.f32 %v230_v5, 0.0 }
  0xfc   :  { %v243_v12 = vpack.c.bf16 %v239_v8, %v238_v7 }
  0xfe   :  { %425 = vmatpush.bf16.msra.mxu1 %v243_v12  ;;  %794 = vmatpush.bf16.msra.mxu3 %v243_v12 }
 0x102   :  { %426 = vmatpush.bf16.msra.mxu1 %v242_v18  ;;  %795 = vmatpush.bf16.msra.mxu3 %v242_v18 }
 0x106   :  { %427 = vmatpush.bf16.msra.mxu1 %v241_v23  ;;  %796 = vmatpush.bf16.msra.mxu3 %v241_v23 }
 0x10a   :  { %428 = vmatpush.bf16.msra.mxu1 %v240_v25  ;;  %797 = vmatpush.bf16.msra.mxu3 %v240_v25 }
 0x10d   :  { %745 = vmatmul.msk.bf16.vlgmr.msra.gmra.mxu1 %vm396_vm1, %v782_v26  ;;  %751 = vmatmul.msk.bf16.vlgmr.msra.gmra.mxu3 %vm396_vm1, %v788_v27 }
 0x11d   :  { %746 = vmatmul.msk.bf16.gmra.mxu1 %vm396_vm1, %v783_v28  ;;  %752 = vmatmul.msk.bf16.gmra.mxu3 %vm396_vm1, %v789_v29 }
 0x12d   :  { %747 = vmatmul.msk.bf16.gmra.mxu1 %vm396_vm1, %v784_v30 }
 0x13d   :  { %748 = vmatmul.msk.bf16.gmra.mxu1 %vm396_vm1, %v785_v31 }
 0x14d   :  { %749 = vmatmul.msk.bf16.gmra.mxu1 %vm396_vm1, %v786_v32 }
 0x15d   :  { %750 = vmatmul.msk.bf16.gmra.mxu1 %vm396_vm1, %v787_v33 }
 0x18a   :  { %v430_v45 = vpop.f32.mrf.mxu1 }
 0x18b   :  { %v431_v49 = vadd.f32 %v430_v45, %v279_v47 }
 0x18d   :  { %v470_v53 = vmax.f32 %v431_v49, 0.0 }
 0x190   :  { %v460_v48 = vpop.f32.mrf.mxu3 }
 0x191   :  { %v461_v8 = vadd.f32 %v460_v48, %v339_v35 }
 0x192   :  { %v432_v51 = vpop.f32.mrf.mxu1 }
 0x193   :  { %v433_v52 = vadd.f32 %v432_v51, %v284_v50  ;;  %v482_v13 = vmax.f32 %v461_v8, 0.0 }
 0x195   :  { %v471_v54 = vmax.f32 %v433_v52, 0.0  ;;  %v548_v52 = vpop.permute.xlu1 %547 }
 0x197   :  { %v486_v55 = vpack.c.bf16 %v471_v54, %v470_v53  ;;  %v543_v53 = vpop.permute.xlu0 %542 }
 0x198   :  { %v462_v57 = vpop.f32.mrf.mxu3 }
 0x199   :  { %v463_v5 = vadd.f32 %v462_v57, %v344_v36 }
 0x19a   :  { %v435_v58 = vpop.f32.mrf.mxu1 }
 0x19b   :  { %v436_v60 = vadd.f32 %v435_v58, %v289_v44  ;;  %v483_v11 = vmax.f32 %v463_v5, 0.0 }
 0x19d   :  { %v472_v0 = vmax.f32 %v436_v60, 0.0  ;;  %v492_v14 = vpack.c.bf16 %v483_v11, %v482_v13 }
 0x19f   :  { %v538_v58 = vpop.permute.xlu0 %537 }
 0x1a0   :  { %v465_v59 = vpop.f32.mrf.mxu3 }
 0x1a1   :  { %v466_v2 = vadd.f32 %v465_v59, %v349_v34 }
 0x1a2   :  { %v437_v62 = vpop.f32.mrf.mxu1 }
 0x1a3   :  { %v438_v63 = vadd.f32 %v437_v62, %v294_v61  ;;  %v484_v9 = vmax.f32 %v466_v2, 0.0 }
 0x1a5   :  { %v473_v1 = vmax.f32 %v438_v63, 0.0 }
 0x1a7   :  { %v487_v3 = vpack.c.bf16 %v473_v1, %v472_v0  ;;  %v513_v11 = vpop.permute.xlu0 %512 }
 0x1a8   :  { %v467_v4 = vpop.f32.mrf.mxu3 }
 0x1a9   :  { %v468_v6 = vadd.f32 %v467_v4, %v354_v39 }
 0x1aa   :  { %v440_v7 = vpop.f32.mrf.mxu1 }
 0x1ab   :  { %v485_v10 = vmax.f32 %v468_v6, 0.0  ;;  %v441_v36 = vadd.f32 %v440_v7, %v299_v56  ;;  %v523_v56 = vpop.permute.xlu1 %522 }
 0x1ad   :  { %v493_v12 = vpack.c.bf16 %v485_v10, %v484_v9  ;;  %v474_v45 = vmax.f32 %v441_v36, 0.0 }
 0x1af   :  { %574 = vmatpush.bf16.msra.mxu2 %v493_v12 }
 0x1b2   :  { %v442_v15 = vpop.f32.mrf.mxu1 }
 0x1b3   :  { %575 = vmatpush.bf16.msra.mxu2 %v492_v14  ;;  %v443_v33 = vadd.f32 %v442_v15, %v304_v43  ;;  %v793_v43 = vld [vmem:[%s1086_s5 + $0x18] sm:$0xff]  ;;  %v518_v7 = vpop.permute.xlu1 %517 }
 0x1b5   :  { %v475_v44 = vmax.f32 %v443_v33, 0.0 }
 0x1ba   :  { %v445_v16 = vpop.f32.mrf.mxu1 }
 0x1bb   :  { %v446_v31 = vadd.f32 %v445_v16, %v309_v40  ;;  %v791_v40 = vld [vmem:[%s1086_s5 + $0x8] sm:$0xff] }
 0x1bd   :  { %v476_v39 = vmax.f32 %v446_v31, 0.0 }
 0x1c2   :  { %v447_v17 = vpop.f32.mrf.mxu1 }
 0x1c3   :  { %v448_v28 = vadd.f32 %v447_v17, %v314_v41  ;;  %v792_v41 = vld [vmem:[%s1086_s5 + $0x10] sm:$0xff] }
 0x1c5   :  { %v477_v34 = vmax.f32 %v448_v28, 0.0 }
 0x1ca   :  { %v450_v18 = vpop.f32.mrf.mxu1 }
 0x1cb   :  { %v451_v25 = vadd.f32 %v450_v18, %v319_v38  ;;  %v790_v38 = vld [vmem:[%s1086_s5] sm:$0xff] }
 0x1cc   :  { %v615_v18 = vld [vmem:[%s1088_s7] sm:$0x1] }
 0x1cd   :  { %v478_v32 = vmax.f32 %v451_v25, 0.0 }
 0x1d2   :  { %v452_v19 = vpop.f32.mrf.mxu1 }
 0x1d3   :  { %v453_v23 = vadd.f32 %v452_v19, %v324_v46 }
 0x1d5   :  { %v479_v29 = vmax.f32 %v453_v23, 0.0 }
 0x1d7   :  { %v490_v35 = vpack.c.bf16 %v479_v29, %v478_v32 }
 0x1da   :  { %v455_v20 = vpop.f32.mrf.mxu1 }
 0x1db   :  { %v456_v21 = vadd.f32 %v455_v20, %v329_v42  ;;  %v489_v42 = vpack.c.bf16 %v477_v34, %v476_v39 }
 0x1dd   :  { %v480_v26 = vmax.f32 %v456_v21, 0.0 }
 0x1e2   :  { %v457_v22 = vpop.f32.mrf.mxu1 }
 0x1e3   :  { %v458_v24 = vadd.f32 %v457_v22, %v334_v37  ;;  %v488_v37 = vpack.c.bf16 %v475_v44, %v474_v45  ;;  %v638_v22 = vlaneseq }
 0x1e5   :  { %v481_v27 = vmax.f32 %v458_v24, 0.0  ;;  %v639_v24 = vshrl.u32 %v638_v22, 7 }
 0x1e7   :  { %v491_v30 = vpack.c.bf16 %v481_v27, %v480_v26  ;;  %vm640_vm2 = vcmp.eq.s32.totalorder %v639_v24, 1 }
 0x1e9   :  { %576 = vmatpush.bf16.msra.mxu2 %v491_v30 }
 0x1ed   :  { %577 = vmatpush.bf16.msra.mxu2 %v490_v35 }
 0x1f1   :  { %578 = vmatpush.bf16.msra.mxu2 %v489_v42 }
 0x1f5   :  { %579 = vmatpush.bf16.msra.mxu2 %v488_v37 }
 0x1f9   :  { %580 = vmatpush.bf16.msra.mxu2 %v487_v3 }
 0x1fd   :  { %581 = vmatpush.bf16.msra.mxu2 %v486_v55  ;;  %v533_v55 = vpop.permute.xlu2 %532 }
 0x200   :  { %582 = vmatmul.bf16.vlgmr.msra.gmra.mxu2 %v790_v38 }
 0x205   :  { %v528_v1 = vpop.permute.xlu2 %527 }
 0x20d   :  { %v620_v19 = vpop.permute.xlu2 %619 }
 0x210   :  { %587 = vmatmul.bf16.gmra.mxu2 %v791_v40 }
 0x220   :  { %592 = vmatmul.bf16.gmra.mxu2 %v792_v41 }
 0x230   :  { %597 = vmatmul.bf16.gmra.mxu2 %v793_v43 }
 0x283   :  { %v583_v46 = vpop.f32.mrf.mxu2 }
 0x284   :  { %v584_v12 = vadd.f32 %v583_v46, %v513_v11 }
 0x286   :  { %v603_v16 = vmax.f32 %v584_v12, 0.0 }
 0x28b   :  { %v585_v47 = vpop.f32.mrf.mxu2 }
 0x28c   :  { %v586_v8 = vadd.f32 %v585_v47, %v518_v7 }
 0x28e   :  { %v604_v14 = vmax.f32 %v586_v8, 0.0 }
 0x290   :  { %v611_v17 = vpack.c.bf16 %v604_v14, %v603_v16 }
 0x293   :  { %v588_v48 = vpop.f32.mrf.mxu2 }
 0x294   :  { %v589_v5 = vadd.f32 %v588_v48, %v523_v56 }
 0x296   :  { %v605_v13 = vmax.f32 %v589_v5, 0.0 }
 0x29b   :  { %v590_v49 = vpop.f32.mrf.mxu2 }
 0x29c   :  { %v591_v2 = vadd.f32 %v590_v49, %v528_v1 }
 0x29e   :  { %v606_v9 = vmax.f32 %v591_v2, 0.0 }
 0x2a0   :  { %v612_v15 = vpack.c.bf16 %v606_v9, %v605_v13 }
 0x2a3   :  { %v593_v50 = vpop.f32.mrf.mxu2 }
 0x2a4   :  { %v594_v62 = vadd.f32 %v593_v50, %v533_v55 }
 0x2a6   :  { %v607_v6 = vmax.f32 %v594_v62, 0.0 }
 0x2ab   :  { %v595_v51 = vpop.f32.mrf.mxu2 }
 0x2ac   :  { %v596_v60 = vadd.f32 %v595_v51, %v538_v58 }
 0x2ae   :  { %v608_v3 = vmax.f32 %v596_v60, 0.0 }
 0x2b0   :  { %v613_v10 = vpack.c.bf16 %v608_v3, %v607_v6 }
 0x2b3   :  { %v598_v54 = vpop.f32.mrf.mxu2 }
 0x2b4   :  { %v599_v57 = vadd.f32 %v598_v54, %v543_v53 }
 0x2b6   :  { %v609_v63 = vmax.f32 %v599_v57, 0.0 }
 0x2bb   :  { %v600_v59 = vpop.f32.mrf.mxu2 }
 0x2bc   :  { %v601_v61 = vadd.f32 %v600_v59, %v548_v52 }
 0x2be   :  { %v610_v0 = vmax.f32 %v601_v61, 0.0 }
 0x2c0   :  { %v614_v4 = vpack.c.bf16 %v610_v0, %v609_v63 }
 0x2c2   :  { %629 = vmatpush.bf16.msrb.mxu3 %v614_v4 }
 0x2c6   :  { %630 = vmatpush.bf16.msrb.mxu3 %v613_v10 }
 0x2ca   :  { %631 = vmatpush.bf16.msrb.mxu3 %v612_v15 }
 0x2ce   :  { %632 = vmatpush.bf16.msrb.mxu3 %v611_v17 }
 0x2d1   :  { %769 = vmatmul.msk.bf16.vlgmr.msrb.gmra.mxu3 %vm396_vm1, %v615_v18 }
 0x354   :  { %v634_v20 = vpop.f32.mrf.mxu3 }
 0x355   :  { %v635_v21 = vadd.f32 %v634_v20, %v620_v19 }
 0x357   :  { %v641_v23 = vmul.f32 1.442695, %v635_v21 }
 0x359   :  { %803 = vpow2.f32 %v641_v23 }
 0x35c   :  { %v636_v25 = vpop.f32.mrf.mxu3 }
 0x35f   :  { %v804_v26 = vpop.eup %803 }
 0x360   :  { %v643_v27 = vsel %vm640_vm2, %v804_v26, %v635_v21 }
 0x361   :  { %644 = vst [vmem:[#allocation2] sm:$0x3] %v643_v27 }
 0x362   :  { %655 = dma.vmem_to_hbm [thread:$0]  %s651_s4, 32, %s653_s6, [#allocation3]  }
 0x363   :  { %829 = dma.done.wait [#allocation3], 32  }
 0x364   :  { %830 = vsyncadd [#allocation3], 4294967264 }
 0x365   :  { %660 = vsyncpa [#allocation3], 1 }

</bundles_post_ra>
